<compile_context>
chip_gen: v6e
topology: v6e:2x2x1
jax: 0.10.0
libtpu: 0.0.40
codegen_flags: <defaults>
</compile_context>

<pallas_src>
import functools

import jax
import jax.numpy as jnp
from jax.experimental import pallas as pl
from jax.experimental.pallas import tpu as pltpu


def edge_decoder_kernel(zp_ref, zl_ref, w_ref, b_ref, out_ref, *, embed_dim, pack):
    # zp_ref / zl_ref: [tile_p, pack * embed_dim]  (pack edges folded per row, lane-dense)
    # w_ref:           [1, pack * embed_dim]       (Linear weight tiled `pack` times)
    # b_ref:           SMEM (1, 1) scalar bias
    # out_ref:         [tile_p, pack]
    x = zp_ref[...] * zl_ref[...]                                  # elementwise product (VPU)
    xw = x.astype(jnp.float32) * w_ref[...].astype(jnp.float32)    # f32 accumulation path
    parts = []
    for k in range(pack):                                          # segmented row-reduce per packed edge
        seg = xw[:, k * embed_dim:(k + 1) * embed_dim]
        parts.append(jnp.sum(seg, axis=-1, keepdims=True))         # [tile_p, 1]
    acc = parts[0] if pack == 1 else jnp.concatenate(parts, axis=-1)  # [tile_p, pack]
    out_ref[...] = (acc + b_ref[0, 0]).astype(out_ref.dtype)


def edge_decoder(z_paper, z_label, w, b, *, max_tile_rows=2048, target_grid_steps=4):
    """out[n] = sum_e(z_paper[n, e] * z_label[n, e] * w[0, e]) + b  -> shape [N]."""
    N, E = z_paper.shape
    dtype = z_paper.dtype

    # Fold P consecutive edges into one 128-lane row when E divides 128 (zero-copy view).
    P = 128 // E if (E < 128 and 128 % E == 0) else 1
    n_pad = (-N) % P
    if n_pad:
        z_paper = jnp.pad(z_paper, ((0, n_pad), (0, 0)))
        z_label = jnp.pad(z_label, ((0, n_pad), (0, 0)))
    Np = (N + n_pad) // P
    W = P * E
    zp = z_paper.reshape(Np, W)                       # row-major repack (lane-dense)
    zl = z_label.reshape(Np, W)
    w_packed = jnp.tile(jnp.asarray(w, jnp.float32).reshape(1, E), (1, P))
    b_smem = jnp.asarray(b, jnp.float32).reshape(1, 1)   # PyTorch bias is shape (1,)

    # Tile choice: big tiles to amortize per-step overhead, but keep >= target_grid_steps
    # grid steps so v7x's two TensorCores can split the parallel grid axis.
    tile_p = max(8, min(max_tile_rows, pl.cdiv(Np, target_grid_steps)))
    tile_p = -(-tile_p // 8) * 8                      # sublane multiple
    tile_p = min(tile_p, -(-Np // 8) * 8)
    grid = (pl.cdiv(Np, tile_p),)

    itemsize = jnp.dtype(dtype).itemsize
    cost = pl.CostEstimate(
        flops=3 * N * E,
        transcendentals=0,
        bytes_accessed=2 * N * E * itemsize + N * itemsize + E * 4,
    )

    kernel = functools.partial(edge_decoder_kernel, embed_dim=E, pack=P)
    out2d = pl.pallas_call(
        kernel,
        out_shape=jax.ShapeDtypeStruct((Np, P), dtype),
        grid_spec=pltpu.PrefetchScalarGridSpec(
            num_scalar_prefetch=0,
            grid=grid,
            in_specs=[
                pl.BlockSpec((tile_p, W), lambda i: (i, 0)),   # z_paper packed tile
                pl.BlockSpec((tile_p, W), lambda i: (i, 0)),   # z_label packed tile
                pl.BlockSpec((1, W), lambda i: (0, 0)),        # tiled Linear weight (resident)
                pl.BlockSpec(memory_space=pltpu.SMEM),         # bias scalar
            ],
            out_specs=pl.BlockSpec((tile_p, P), lambda i: (i, 0)),
        ),
        compiler_params=pltpu.CompilerParams(
            dimension_semantics=("parallel",),
            # 2 inputs x 2 pipeline buffers x (<=2048 x 128 x 4B) = 4 MiB worst case:
            # well under v5e's 16 MiB scoped default and v7x's 64 MiB physical VMEM.
            vmem_limit_bytes=32 * 1024 * 1024,
        ),
        cost_estimate=cost,
    )(zp, zl, w_packed, b_smem)

    return out2d.reshape(Np * P)[:N]                  # unpack + squeeze(-1)


if __name__ == "__main__":
    key = jax.random.PRNGKey(0)
    k_zp, k_zl, k_w, k_b = jax.random.split(key, 4)

    N = 128            # number of edges / node pairs
    E = 32             # embedding_size

    z_paper = jax.random.normal(k_zp, (N, E), dtype=jnp.float32)
    z_label = jax.random.normal(k_zl, (N, E), dtype=jnp.float32)

    # Deterministic Linear(E, 1) parameters (PyTorch-style uniform range 1/sqrt(E)).
    bound = 1.0 / (E ** 0.5)
    w = jax.random.uniform(k_w, (1, E), minval=-bound, maxval=bound, dtype=jnp.float32)
    b = jax.random.uniform(k_b, (1,), minval=-bound, maxval=bound, dtype=jnp.float32)

    out = edge_decoder(z_paper, z_label, w, b)
    out = jax.block_until_ready(out)

    # Pure-JAX reference for sanity.
    ref = jnp.squeeze((z_paper * z_label) @ w.T, axis=-1) + b[0]
    assert out.shape == (N,)
    assert jnp.allclose(out, ref, atol=1e-5, rtol=1e-5)

    print("KERNEL_OK")
</pallas_src>

<mosaic_0001>
module attributes {stable_mosaic.version = 11 : i64} {
  func.func @edge_decoder_kernel(%arg0: i32, %arg1: memref<8x128xf32, #tpu.memory_space<vmem>>, %arg2: memref<8x128xf32, #tpu.memory_space<vmem>>, %arg3: memref<1x128xf32, #tpu.memory_space<vmem>>, %arg4: memref<1x1xf32, #tpu.memory_space<smem>>, %arg5: memref<8x4xf32, #tpu.memory_space<vmem>>) attributes {dimension_semantics = [#tpu.dimension_semantics<parallel>], iteration_bounds = array<i64: 4>, scalar_prefetch = 0 : i64, scratch_operands = 0 : i64, tpu.core_type = #tpu.core_type<tc>, window_params = [{transform_indices = @transform_0, window_bounds = array<i64: 8, 128>}, {transform_indices = @transform_1, window_bounds = array<i64: 8, 128>}, {pipeline_mode = #tpu.pipeline_mode<synchronous>, transform_indices = @transform_2, window_bounds = array<i64: 1, 128>}, {transform_indices = @transform_3, window_bounds = array<i64: 1, 1>}, {transform_indices = @transform_4, window_bounds = array<i64: 8, 4>}]} {
    %c0 = arith.constant 0 : index
    %c0_0 = arith.constant 0 : index
    %0 = vector.load %arg1[%c0, %c0_0] : memref<8x128xf32, #tpu.memory_space<vmem>>, vector<8x128xf32>
    %c0_1 = arith.constant 0 : index
    %c0_2 = arith.constant 0 : index
    %1 = vector.load %arg2[%c0_1, %c0_2] : memref<8x128xf32, #tpu.memory_space<vmem>>, vector<8x128xf32>
    %2 = arith.mulf %0, %1 : vector<8x128xf32>
    %c0_3 = arith.constant 0 : index
    %c0_4 = arith.constant 0 : index
    %3 = vector.load %arg3[%c0_3, %c0_4] : memref<1x128xf32, #tpu.memory_space<vmem>>, vector<1x128xf32>
    %4 = vector.broadcast %3 : vector<1x128xf32> to vector<8x128xf32>
    %5 = arith.mulf %2, %4 : vector<8x128xf32>
    %6 = vector.extract_strided_slice %5 {offsets = [0, 0], sizes = [8, 32], strides = [1, 1]} : vector<8x128xf32> to vector<8x32xf32>
    %cst = arith.constant dense<0.000000e+00> : vector<8xf32>
    %7 = vector.multi_reduction <add>, %6, %cst [1] : vector<8x32xf32> to vector<8xf32>
    %8 = vector.shape_cast %7 : vector<8xf32> to vector<8x1xf32>
    %9 = vector.extract_strided_slice %5 {offsets = [0, 32], sizes = [8, 32], strides = [1, 1]} : vector<8x128xf32> to vector<8x32xf32>
    %cst_5 = arith.constant dense<0.000000e+00> : vector<8xf32>
    %10 = vector.multi_reduction <add>, %9, %cst_5 [1] : vector<8x32xf32> to vector<8xf32>
    %11 = vector.shape_cast %10 : vector<8xf32> to vector<8x1xf32>
    %12 = vector.extract_strided_slice %5 {offsets = [0, 64], sizes = [8, 32], strides = [1, 1]} : vector<8x128xf32> to vector<8x32xf32>
    %cst_6 = arith.constant dense<0.000000e+00> : vector<8xf32>
    %13 = vector.multi_reduction <add>, %12, %cst_6 [1] : vector<8x32xf32> to vector<8xf32>
    %14 = vector.shape_cast %13 : vector<8xf32> to vector<8x1xf32>
    %15 = vector.extract_strided_slice %5 {offsets = [0, 96], sizes = [8, 32], strides = [1, 1]} : vector<8x128xf32> to vector<8x32xf32>
    %cst_7 = arith.constant dense<0.000000e+00> : vector<8xf32>
    %16 = vector.multi_reduction <add>, %15, %cst_7 [1] : vector<8x32xf32> to vector<8xf32>
    %17 = vector.shape_cast %16 : vector<8xf32> to vector<8x1xf32>
    %18 = tpu.concatenate %8, %11, %14, %17 in 1 : vector<8x1xf32>, vector<8x1xf32>, vector<8x1xf32>, vector<8x1xf32> -> vector<8x4xf32>
    %c0_8 = arith.constant 0 : index
    %c0_9 = arith.constant 0 : index
    %19 = memref.load %arg4[%c0_8, %c0_9] : memref<1x1xf32, #tpu.memory_space<smem>>
    %20 = vector.broadcast %19 : f32 to vector<8x4xf32>
    %21 = arith.addf %18, %20 : vector<8x4xf32>
    %c0_10 = arith.constant 0 : index
    %c0_11 = arith.constant 0 : index
    %22 = vector.load %arg5[%c0_10, %c0_11] : memref<8x4xf32, #tpu.memory_space<vmem>>, vector<8x4xf32>
    tpu.vector_store %arg5[%c0_10, %c0_11], %21 {strides = array<i32>} : memref<8x4xf32, #tpu.memory_space<vmem>>, vector<8x4xf32>,
    return
  }
  func.func @transform_0(%arg0: i32) -> (i32, i32) {
    %c0_i32 = arith.constant 0 : i32
    %c0_i32_0 = arith.constant 0 : i32
    return %arg0, %c0_i32 : i32, i32
  }
  func.func @transform_1(%arg0: i32) -> (i32, i32) {
    %c0_i32 = arith.constant 0 : i32
    %c0_i32_0 = arith.constant 0 : i32
    return %arg0, %c0_i32 : i32, i32
  }
  func.func @transform_2(%arg0: i32) -> (i32, i32) {
    %c0_i32 = arith.constant 0 : i32
    %c0_i32_0 = arith.constant 0 : i32
    %c0_i32_1 = arith.constant 0 : i32
    return %c0_i32, %c0_i32_0 : i32, i32
  }
  func.func @transform_3(%arg0: i32) -> (i32, i32) {
    %c0_i32 = arith.constant 0 : i32
    %c0_i32_0 = arith.constant 0 : i32
    %c0_i32_1 = arith.constant 0 : i32
    return %c0_i32, %c0_i32_0 : i32, i32
  }
  func.func @transform_4(%arg0: i32) -> (i32, i32) {
    %c0_i32 = arith.constant 0 : i32
    %c0_i32_0 = arith.constant 0 : i32
    return %arg0, %c0_i32 : i32, i32
  }
}

</mosaic_0001>

<bundles_post_ra>
// kernel: tpu_custom_call.1
= control target key start
LH: loop header
LB: loop body
LE: loop exit
PB: predicated region body
PF: predicated region fallthrough
CT: control target
= control target key end

     0   :  { %s729_s0 = inlined_call_operand.hbm [shape: f32[32,128], index: 0, kind: input, shape index: {}]   ;;  %s730_s1 = inlined_call_operand.hbm [shape: f32[32,128], index: 1, kind: input, shape index: {}]   ;;  %s731_s2 = inlined_call_operand.vmem [shape: f32[1,128], index: 2, kind: input, shape index: {}]   ;;  %s732_s3 = inlined_call_operand.<no memory space> [shape: f32[1,1], index: 3, kind: input, shape index: {}]   ;;  %s733_s4 = inlined_call_operand.vmem [shape: f32[32,4], index: 4, kind: output, shape index: {}]  }
   0x1   :  { %9 = sst [smem:[#allocation2]] %s732_s3 }
   0x2   :  { %10 = vsyncpa [#allocation4], 0 }
   0x3   :  { %12 = vsyncpa [#allocation4 + $0x1], 0 }
   0x4   :  { %13 = vsyncpa [#allocation6], 0 }
   0x5   :  { %15 = vsyncpa [#allocation6 + $0x1], 0  ;;  %s574_s17 = smov 0   ;;  %s576_s18 = smov 0  }
   0x6   :  { %s578_s19 = smov 0   ;;  %s580_s20 = smov 0  }
   0x7 LB: > { %s593_s3 = sadd.s32 4294967295, %s539_s20   ;;  %s596_s21 = sadd.s32 1, %s539_s20   ;;  %s539_s20 = sphi %s580_s20, %s745_s20   ;;  %s535_s19 = sphi %s578_s19, %s744_s19   ;;  %s531_s18 = sphi %s576_s18, %s743_s18   ;;  %s527_s17 = sphi %s574_s17, %s742_s17  }
   0x8   : > { %s25_s22 = ssub.s32 %s539_s20, %s596_s21  ;;  %s28_s23 = sadd.s32 1, %s535_s19 }
   0x9   : > { %p26_p0 = scmp.eq.s32.totalorder %s25_s22, 0  ;;  %p35_p1 = scmp.ne.s32.totalorder %s535_s19, %s531_s18 }
   0xa   : > { %p36_p2 = scmp.eq.s32.totalorder %s539_s20, 0  ;;  %p41_p3 = scmp.ne.s32.totalorder %s531_s18, %s527_s17 }
   0xb   : > { %s606_s24 = scalar_select %p26_p0, %s535_s19, %s28_s23  }
   0xc   : > { %p37_p4 = por %p36_p2, %p35_p1  ;;  %p42_p5 = scmp.eq.s32.totalorder %s593_s3, 0 }
   0xd   : > { %p409_p6 = scmp.lt.s32.totalorder %s539_s20, 4  ;;  %s615_s26 = sand.u32 1, %s535_s19  }
   0xe   : > { %p610_p7 = por %p42_p5, %p41_p3  ;;  %s387_s27 = sshll.u32 %s615_s26, 3 }
   0xf   : > { %s388_s28 = sshll.u32 %s539_s20, 7  ;;  %s169_s6 = scalar_lea.vmem [#allocation3], %s387_s27 }
  0x10   : > { %s735_s25 = scalar_select %p610_p7, 1, 0 }
  0x11   : > { %s624_s5 = scalar_lea.hbm %s729_s0, %s388_s28  ;;  %s176_s7 = sshll.u32 %s169_s6, 4  ;;  %s628_s7 = int_to_ptr.vmem [resolvable:$true] %s176_s7 }
  0x12   : > { %p630_p8 = pnand %p409_p6, %p37_p4  ;;  %s166_s9 = scalar_lea.sflag [#allocation4], %s615_s26 }
  0x13   : > { %s445_s10 = scalar_lea.hbm %s624_s5, 128  ;;  %s450_s13 = scalar_lea.hbm %s729_s0, 512 }
  0x14   : > { %p446_p11 = scmp.ne.s32.totalorder %s624_s5, %s445_s10  ;;  %p447_p12 = pneg %p630_p8 }
  0x15   : > { %p451_p1 = scmp.lt.s32.totalorder %s624_s5, %s729_s0  ;;  %p452_p2 = scmp.lt.s32.totalorder %s450_s13, %s445_s10 }
  0x16   : > { %p448_p13 = pnand %p447_p12, %p446_p11 }
  0x17   : > { %p453_p3 = por %p452_p2, %p451_p1 }
  0x18   : > { %p449_p0 = pneg %p448_p13 }
  0x1a   : > { %p454_p4 = pnand %p453_p3, %p449_p0 }
  0x1c   : > { %457 = shalt.err (!%p454_p4)
}
  0x1d   : > { %s458_s16 = scalar_lea.vmem %s628_s7, 128  ;;  %s541_s17 = smov [#allocation3]  }
  0x1e   : > { %p459_p5 = scmp.ne.s32.totalorder %s628_s7, %s458_s16  ;;  %s463_s22 = sshll.u32 %s541_s17, 4  ;;  %s464_s22 = int_to_ptr.vmem [resolvable:$false] %s463_s22 }
  0x1f   : > { %s465_s23 = scalar_lea.vmem %s464_s22, 256  ;;  %p466_p13 = scmp.lt.s32.totalorder %s628_s7, %s464_s22 }
  0x20   : > { %p461_p6 = pnand %p459_p5, %p447_p12  ;;  %p467_p9 = scmp.lt.s32.totalorder %s465_s23, %s458_s16 }
  0x22   : > { %p462_p11 = pneg %p461_p6  ;;  %p468_p10 = por %p467_p9, %p466_p13 }
  0x24   : > { %p469_p1 = pnand %p468_p10, %p462_p11 }
  0x26   : > { %472 = shalt.err (!%p469_p1)
}
  0x27   : > { %405 = dma.hbm_to_vmem [thread:$0]  (!%p630_p8), %s624_s5, 128, %s628_s7, %s166_s9  }
  0x28   : > { %p737_p0 = scmp.lt.s32.totalorder %s539_s20, 5  ;;  %p738_p2 = scmp.ge.s32.totalorder %s539_s20, 1 }
  0x29   : > { %s674_s10 = scalar_lea.hbm %s730_s1, %s388_s28  ;;  %s187_s11 = scalar_lea.vmem [#allocation5], %s387_s27 }
  0x2a   : > { %p665_p3 = pnand %p738_p2, %p737_p0  ;;  %s194_s12 = sshll.u32 %s187_s11, 4  ;;  %s195_s12 = int_to_ptr.vmem [resolvable:$true] %s194_s12 }
  0x2b   : > { %s184_s5 = scalar_lea.sflag [#allocation6], %s615_s26  ;;  %s473_s7 = scalar_lea.hbm %s674_s10, 128 }
  0x2c   : > { %s739_s29 = scalar_select %p665_p3, 1, 0 }
  0x2d   : > { %p474_p9 = scmp.ne.s32.totalorder %s674_s10, %s473_s7  ;;  %s478_s13 = scalar_lea.hbm %s730_s1, 512 }
  0x2e   : > { %p479_p5 = scmp.lt.s32.totalorder %s674_s10, %s730_s1  ;;  %p480_p6 = scmp.lt.s32.totalorder %s478_s13, %s473_s7 }
  0x2f   : > { %p476_p10 = pnand %p474_p9, %p447_p12 }
  0x30   : > { %p481_p11 = por %p480_p6, %p479_p5 }
  0x31   : > { %p477_p4 = pneg %p476_p10 }
  0x33   : > { %p482_p13 = pnand %p481_p11, %p477_p4 }
  0x35   : > { %485 = shalt.err (!%p482_p13)
}
  0x36   : > { %s486_s27 = scalar_lea.vmem %s195_s12, 128  ;;  %s542_s26 = smov [#allocation5]  }
  0x37   : > { %p487_p1 = scmp.ne.s32.totalorder %s195_s12, %s486_s27  ;;  %s491_s15 = sshll.u32 %s542_s26, 4  ;;  %s492_s15 = int_to_ptr.vmem [resolvable:$false] %s491_s15 }
  0x38   : > { %s493_s16 = scalar_lea.vmem %s492_s15, 256  ;;  %p494_p9 = scmp.lt.s32.totalorder %s195_s12, %s492_s15 }
  0x39   : > { %p489_p0 = pnand %p487_p1, %p447_p12  ;;  %p495_p10 = scmp.lt.s32.totalorder %s493_s16, %s486_s27 }
  0x3b   : > { %p490_p2 = pneg %p489_p0  ;;  %p496_p7 = por %p495_p10, %p494_p9 }
  0x3d   : > { %p497_p3 = pnand %p496_p7, %p490_p2 }
  0x3f   : > { %500 = shalt.err (!%p497_p3)
}
  0x40   : > { %408 = dma.hbm_to_vmem [thread:$0]  (!%p630_p8), %s674_s10, 128, %s195_s12, %s184_s5  }
  0x41   : > { %p740_p4 = scmp.ne.s32.totalorder %s739_s29, 0 }
  0x42   : > { %s205_s17 = sand.u32 (!%p740_p4), 1, %s531_s18   ;;  %p741_p12 = scmp.ne.s32.totalorder (!%p740_p4), %s735_s25, 0 }
  0x43   : > { %203 = sbr.rel (%p740_p4) target bundleno = 343 (0x157), region = 36  ;;  %s392_s22 = sshll.u32 (!%p740_p4), %s205_s17, 3 }
  0x44   : > { %s206_s23 = scalar_lea.sflag (!%p740_p4), [#allocation4], %s205_s17  ;;  %s209_s30 = scalar_lea.vmem (!%p740_p4), [#allocation3], %s392_s22 }
  0x48   : > { %518 = dma.done.wait (%p741_p12), %s206_s23, 128  }
  0x49   : > { %520 = vsyncadd (%p741_p12), %s206_s23, 4294967168  ;;  %s215_s6 = scalar_lea.sflag [#allocation6], %s205_s17  ;;  %s218_s11 = scalar_lea.vmem [#allocation5], %s392_s22 }
  0x4a   : > { %522 = dma.done.wait (%p741_p12), %s215_s6, 128  }
  0x4b   : > { %524 = vsyncadd (%p741_p12), %s215_s6, 4294967168  ;;  %v251_v0 = vld [vmem:[%s209_s30] sm:$0xff]  ;;  %v252_v1 = vld [vmem:[%s218_s11] sm:$0xff]  ;;  %s543_s10 = smov 96   ;;  %s544_s12 = smov 32   ;;  %vm262_vm0 = vcmask 261120  }
  0x4c   : > { %v395_v2 = vld [vmem:[%s731_s2] ss:$0 sm:$0xff]  ;;  %v253_v3 = vmul.f32 %v252_v1, %v251_v0  ;;  %s545_s5 = smov 64   ;;  %p247_p7 = scmp.lt.s32.totalorder %s593_s3, 3  ;;  %vm285_vm1 = vcmask 7168   ;;  %vm287_vm2 = vcmask 15360  }
  0x4d   : > { %s291_s25 = sld [smem:[#allocation2]]  ;;  %vm289_vm3 = vcmask 23552   ;;  %vm294_vm4 = vcmask 31744  }
  0x4e   : > { %v261_v4 = vmul.f32 %v395_v2, %v253_v3  ;;  %s747_s3 = smov (!%p247_p7, %s593_s3), 3 }
  0x4f   : > { %s394_s7 = sshll.u32 %s747_s3, 3 }
  0x50   : > { %267 = vrot.lane.b32.xlu0 %v261_v4, %s543_s10  ;;  %279 = vrot.lane.b32.xlu1 %v261_v4, %s544_s12  ;;  %v263_v5 = vsel %vm262_vm0, %v261_v4, 0.0  ;;  %s250_s13 = scalar_lea.vmem %s733_s4, %s394_s7 }
  0x53   : > { %v292_v17 = vstv %s291_s25 }
  0x54   : > { %273 = vrot.lane.b32.xlu0 %v261_v4, %s545_s5 }
  0x74   : > { %264 = vadd.xlane.f32.xlu1 %v263_v5 }
  0xc2   : > { %v268_v6 = vpop.permute.xlu0 %267  ;;  %v280_v7 = vpop.permute.xlu1 %279 }
  0xc3   : > { %v270_v8 = vsel %vm262_vm0, %v268_v6, 0.0  ;;  %v282_v9 = vsel %vm262_vm0, %v280_v7, 0.0 }
  0xc4   : > { %271 = vadd.xlane.f32.xlu0 %v270_v8  ;;  %283 = vadd.xlane.f32.xlu1 %v282_v9 }
  0xc6   : > { %v274_v10 = vpop.permute.xlu0 %273 }
  0xc7   : > { %v276_v11 = vsel %vm262_vm0, %v274_v10, 0.0 }
  0xc8   : > { %277 = vadd.xlane.f32.xlu0 %v276_v11 }
  0xfd   : > { %v265_v12 = vpop.xlane.xlu1 %264 }
 0x14d   : > { %v272_v13 = vpop.xlane.xlu0 %271  ;;  %v284_v14 = vpop.xlane.xlu1 %283 }
 0x14e   : > { %v286_v15 = vsel %vm285_vm1, %v265_v12, %v272_v13 }
 0x151   : > { %v278_v16 = vpop.xlane.xlu0 %277 }
 0x152   : > { %v288_v18 = vsel %vm287_vm2, %v286_v15, %v278_v16 }
 0x153   : > { %v290_v19 = vsel %vm289_vm3, %v288_v18, %v284_v14 }
 0x154   : > { %v293_v20 = vadd.f32 %v292_v17, %v290_v19 }
 0x156   : > { %295 = vst.msk [vmem:[%s250_s13] sm:$0xff] %vm294_vm4, %v293_v20 }
 0x157 PF: > { %p18_p8 = scmp.ge.s32.totalorder %s596_s21, 6   ;;  %s742_s17 = smov %s531_s18 }
 0x158   : > { %s743_s18 = smov %s535_s19  ;;  %s744_s19 = smov %s606_s24 }
 0x159   : > { %s745_s20 = smov %s596_s21  ;;  %20 = sbr.rel (!%p18_p8) target bundleno = 7 (0x7), region = 89 }
 0x15e   :  { %315 = vsyncpa [#allocation4], 1 }
 0x15f   :  { %317 = vsyncpa [#allocation4 + $0x1], 1 }
 0x160   :  { %318 = vsyncpa [#allocation6], 1 }
 0x161   :  { %320 = vsyncpa [#allocation6 + $0x1], 1 }

</bundles_post_ra>
